<compile_context>
chip_gen: v6e
topology: v6e:2x2x1
jax: 0.10.0
libtpu: 0.0.40
codegen_flags: <defaults>
</compile_context>

<pallas_src>
import jax
import jax.numpy as jnp
from jax import lax
from jax.experimental import pallas as pl
from jax.experimental.pallas import tpu as pltpu


def dkvb_kernel(x_ref, e_ref, ee_ref, v_ref, o_ref, m_sc, acc_sc):
    # Grid = (H, C // TC): program_id(0)=head (parallel), program_id(1)=codebook tile (arbitrary).
    # x_ref : (B, D)       relu'd below; per-head slice delivered by BlockSpec
    # e_ref : (1, TC, D)   key-codebook tile for this head
    # ee_ref: (1, 1, TC)   precomputed ||e||^2 for the same tile
    # v_ref : (1, TC, Dv)  value-codebook tile (streamed, never whole-resident)
    # o_ref : (B, Dv)      output slab for this head (written once, lane-dense)
    # m_sc  : (B, 1)  f32  running min expanded distance  (online argmin carry)
    # acc_sc: (B, Dv) f32  running best value rows        (online value carry)
    c = pl.program_id(1)
    TC = e_ref.shape[1]

    @pl.when(c == 0)
    def _init():
        m_sc[...] = jnp.full_like(m_sc, jnp.inf)
        acc_sc[...] = jnp.zeros_like(acc_sc)

    x_h = jnp.maximum(x_ref[...], 0.0)                          # relu on the head slice, (B, D)

    # argmin_c ||x - e_c||^2 == argmin_c (||e_c||^2 - 2 x.e_c); ||x||^2 is a per-row constant.
    xe = lax.dot_general(x_h, e_ref[0], (((1,), (1,)), ((), ())),
                         preferred_element_type=jnp.float32)    # (B, TC) on the MXU, no e.T
    d2 = ee_ref[0] - 2.0 * xe                                   # single fused VPU pass, (B, TC)

    # Tile-local first-occurrence argmin (exact: m_t is an element of d2, so d2 == m_t is exact).
    m_t = jnp.min(d2, axis=-1, keepdims=True)                   # (B, 1)
    iota = lax.broadcasted_iota(jnp.int32, d2.shape, 1)         # (B, TC)
    loc = jnp.min(jnp.where(d2 == m_t, iota, TC),
                  axis=-1, keepdims=True)                       # (B, 1) local winner

    # Candidate value rows from the streamed tile (exact one-hot matmul, MXU).
    onehot = (iota == loc).astype(jnp.float32)                  # (B, TC)
    cand = jnp.dot(onehot, v_ref[0],
                   preferred_element_type=jnp.float32)          # (B, Dv)

    # Online update; strict '<' keeps the first occurrence across tiles (visited in C order).
    take = m_t < m_sc[...]                                      # (B, 1)
    acc_sc[...] = jnp.where(take, cand, acc_sc[...])
    m_sc[...] = jnp.where(take, m_t, m_sc[...])

    @pl.when(c == pl.num_programs(1) - 1)
    def _finalize():
        o_ref[...] = acc_sc[...]                                # one lane-dense store per head


def dkvb_forward(x, key_embed, values, *, tc=128):
    """x: (B, H*D) f32, key_embed: (H, C, D), values: (H, C, Dv). Returns (B, 1, H*Dv)."""
    B, DIM = x.shape
    H, C, D = key_embed.shape
    Dv = values.shape[-1]
    assert DIM == H * D, "embedding dim must equal num_codebooks * heads_dim"
    assert values.shape[:2] == (H, C)

    # Pick the codebook tile. Bigger tiles amortize per-grid-step overhead; sweep for production
    # (e.g. 256 on v6e/v7x MXU). Falls back to a single full-C tile if C is not tileable.
    tc = min(tc, C)
    if C % tc != 0 or (tc % 128 != 0 and tc != C):
        tc = C
    # TPU layout: per-head column blocks need 128-aligned lane widths (or be the full dim).
    assert H == 1 or D % 128 == 0, "heads_dim must be a multiple of 128 (TODO(synk): pad path)"
    assert H == 1 or Dv % 128 == 0, "dim_memory must be a multiple of 128 (TODO(synk): pad path)"

    # ||e||^2 depends only on static key parameters -> compute once outside the kernel.
    ee = jnp.sum(key_embed * key_embed, axis=-1)[:, None, :]    # (H, 1, C)

    grid = (H, C // tc)
    out = pl.pallas_call(
        dkvb_kernel,
        out_shape=jax.ShapeDtypeStruct((B, H * Dv), jnp.float32),
        grid_spec=pltpu.PrefetchScalarGridSpec(
            num_scalar_prefetch=0,
            grid=grid,
            in_specs=[
                # per-head x slice: contiguous column block of the natural (B, H*D) layout
                pl.BlockSpec((B, D), lambda h, c: (0, h)),
                # streamed key tile (double-buffered by the pipeline)
                pl.BlockSpec((1, tc, D), lambda h, c: (h, c, 0)),
                # matching ||e||^2 tile
                pl.BlockSpec((1, 1, tc), lambda h, c: (h, 0, c)),
                # streamed value tile
                pl.BlockSpec((1, tc, Dv), lambda h, c: (h, c, 0)),
            ],
            # per-head output slab: lane-dense column block of (B, H*Dv)
            out_specs=pl.BlockSpec((B, Dv), lambda h, c: (0, h)),
            scratch_shapes=[
                pltpu.VMEM((B, 1), jnp.float32),    # running min distance
                pltpu.VMEM((B, Dv), jnp.float32),   # running best value rows
            ],
        ),
        compiler_params=pltpu.CompilerParams(
            # heads shard across v7x's two TensorCores; codebook axis carries the online argmin.
            dimension_semantics=("parallel", "arbitrary"),
            # NOTE: at production tile sizes set vmem_limit_bytes explicitly (v5e default scoped
            # VMEM is only 16 MiB); the toy footprint here is a few hundred KiB so defaults are fine.
        ),
    )(x, key_embed, ee, values)

    # 'b (h d)' -> 'b 1 (h d)': adds a singleton axis only, no data movement.
    return out.reshape(B, 1, H * Dv)


def dkvb_reference(x, key_embed, values):
    """Pure-JAX reference of the PyTorch forward (key_optim=False), cdist-style."""
    B, DIM = x.shape
    H, C, D = key_embed.shape
    xr = jax.nn.relu(x).reshape(B, H, D).transpose(1, 0, 2)             # (H, B, D)
    diff = xr[:, :, None, :] - key_embed[:, None, :, :]                 # (H, B, C, D)
    dist = jnp.sqrt(jnp.sum(diff * diff, axis=-1))                      # (H, B, C)
    idx = jnp.argmin(dist, axis=-1)                                     # (H, B), first occurrence
    mems = values[jnp.arange(H)[:, None], idx]                          # (H, B, Dv)
    return mems.transpose(1, 0, 2).reshape(B, 1, H * values.shape[-1])


if __name__ == "__main__":
    # Small, tile-aligned configuration consistent with the module:
    #   dim = 512, num_memory_codebooks (H) = 4, dim_memory (D = Dv) = dim // H = 128,
    #   num_memories (C) = 256, batch B = 8.  tc=128 -> grid (4, 2): exercises both the
    #   parallel head axis and the online argmin across two codebook tiles.
    B, H, C, D = 8, 4, 256, 128
    Dv = D
    DIM = H * D

    key = jax.random.PRNGKey(0)
    kx, ke, kv = jax.random.split(key, 3)

    x = jax.random.normal(kx, (B, DIM), dtype=jnp.float32)
    # key_embed: kaiming_uniform-like deterministic init (synthetic)
    bound = (6.0 / D) ** 0.5
    key_embed = jax.random.uniform(ke, (H, C, D), dtype=jnp.float32,
                                   minval=-bound, maxval=bound)
    # values ~ randn (nn.Parameter(torch.randn(...)))
    values = jax.random.normal(kv, (H, C, Dv), dtype=jnp.float32)

    out = dkvb_forward(x, key_embed, values)
    jax.block_until_ready(out)

    ref = dkvb_reference(x, key_embed, values)
    assert out.shape == (B, 1, H * Dv), out.shape
    assert jnp.allclose(out, ref, atol=1e-5, rtol=1e-5), "mismatch vs reference"

    print("KERNEL_OK")
</pallas_src>

<mosaic_0001>
module attributes {stable_mosaic.version = 11 : i64} {
  func.func @dkvb_kernel(%arg0: i32, %arg1: i32, %arg2: memref<8x128xf32, #tpu.memory_space<vmem>>, %arg3: memref<1x128x128xf32, #tpu.memory_space<vmem>>, %arg4: memref<1x1x128xf32, #tpu.memory_space<vmem>>, %arg5: memref<1x128x128xf32, #tpu.memory_space<vmem>>, %arg6: memref<8x128xf32, #tpu.memory_space<vmem>>, %arg7: memref<8x1xf32, #tpu.memory_space<vmem>>, %arg8: memref<8x128xf32, #tpu.memory_space<vmem>>) attributes {dimension_semantics = [#tpu.dimension_semantics<parallel>, #tpu.dimension_semantics<arbitrary>], iteration_bounds = array<i64: 4, 2>, scalar_prefetch = 0 : i64, scratch_operands = 2 : i64, tpu.core_type = #tpu.core_type<tc>, window_params = [{transform_indices = @transform_0, window_bounds = array<i64: 8, 128>}, {transform_indices = @transform_1, window_bounds = array<i64: 1, 128, 128>}, {transform_indices = @transform_2, window_bounds = array<i64: 1, 1, 128>}, {transform_indices = @transform_3, window_bounds = array<i64: 1, 128, 128>}, {transform_indices = @transform_4, window_bounds = array<i64: 8, 128>}]} {
    %c0_i32 = arith.constant 0 : i32
    %0 = arith.cmpi eq, %arg1, %c0_i32 : i32
    %1 = arith.extui %0 : i1 to i32
    %c0_i32_0 = arith.constant 0 : i32
    %2 = arith.cmpi ne, %1, %c0_i32_0 : i32
    scf.if %2 {
      %cst_27 = arith.constant 0x7F800000 : f32
      %44 = vector.broadcast %cst_27 : f32 to vector<8x1xf32>
      %c0_28 = arith.constant 0 : index
      %c0_29 = arith.constant 0 : index
      %45 = vector.load %arg7[%c0_28, %c0_29] : memref<8x1xf32, #tpu.memory_space<vmem>>, vector<8x1xf32>
      tpu.vector_store %arg7[%c0_28, %c0_29], %44 {strides = array<i32>} : memref<8x1xf32, #tpu.memory_space<vmem>>, vector<8x1xf32>,
      %cst_30 = arith.constant 0.000000e+00 : f32
      %46 = vector.broadcast %cst_30 : f32 to vector<8x128xf32>
      %c0_31 = arith.constant 0 : index
      %c0_32 = arith.constant 0 : index
      %47 = vector.load %arg8[%c0_31, %c0_32] : memref<8x128xf32, #tpu.memory_space<vmem>>, vector<8x128xf32>
      tpu.vector_store %arg8[%c0_31, %c0_32], %46 {strides = array<i32>} : memref<8x128xf32, #tpu.memory_space<vmem>>, vector<8x128xf32>,
    } else {
    }
    %c0 = arith.constant 0 : index
    %c0_1 = arith.constant 0 : index
    %3 = vector.load %arg2[%c0, %c0_1] : memref<8x128xf32, #tpu.memory_space<vmem>>, vector<8x128xf32>
    %cst = arith.constant 0.000000e+00 : f32
    %4 = vector.broadcast %cst : f32 to vector<8x128xf32>
    %5 = arith.maximumf %3, %4 : vector<8x128xf32>
    %c0_2 = arith.constant 0 : index
    %c0_3 = arith.constant 0 : index
    %c0_4 = arith.constant 0 : index
    %6 = vector.load %arg3[%c0_2, %c0_3, %c0_4] : memref<1x128x128xf32, #tpu.memory_space<vmem>>, vector<1x128x128xf32>
    %7 = vector.shape_cast %6 : vector<1x128x128xf32> to vector<128x128xf32>
    %cst_5 = arith.constant dense<0.000000e+00> : vector<8x128xf32>
    %8 = tpu.matmul %5, %7, %cst_5 {dimension_numbers = #tpu.dot_dimension_numbers<[1], [1], [0], [0], [0, 0, 1, 0], [], []>} : vector<8x128xf32>, vector<128x128xf32>, vector<8x128xf32> -> vector<8x128xf32>
    %c0_6 = arith.constant 0 : index
    %c0_7 = arith.constant 0 : index
    %c0_8 = arith.constant 0 : index
    %9 = vector.load %arg4[%c0_6, %c0_7, %c0_8] : memref<1x1x128xf32, #tpu.memory_space<vmem>>, vector<1x1x128xf32>
    %10 = vector.shape_cast %9 : vector<1x1x128xf32> to vector<1x128xf32>
    %cst_9 = arith.constant 2.000000e+00 : f32
    %11 = vector.broadcast %cst_9 : f32 to vector<8x128xf32>
    %12 = arith.mulf %11, %8 : vector<8x128xf32>
    %13 = vector.broadcast %10 : vector<1x128xf32> to vector<8x128xf32>
    %14 = arith.subf %13, %12 : vector<8x128xf32>
    %cst_10 = arith.constant dense<0x7F800000> : vector<8xf32>
    %15 = vector.multi_reduction <minimumf>, %14, %cst_10 [1] : vector<8x128xf32> to vector<8xf32>
    %16 = vector.shape_cast %15 : vector<8xf32> to vector<8x1xf32>
    %17 = tpu.iota {dimensions = array<i32: 1>} : vector<8x128xi32>
    %18 = vector.broadcast %16 : vector<8x1xf32> to vector<8x128xf32>
    %19 = arith.cmpf oeq, %14, %18 : vector<8x128xf32>
    %c128_i32 = arith.constant 128 : i32
    %20 = vector.broadcast %c128_i32 : i32 to vector<8x128xi32>
    %21 = arith.select %19, %17, %20 : vector<8x128xi1>, vector<8x128xi32>
    %cst_11 = arith.constant dense<2147483647> : vector<8xi32>
    %22 = vector.multi_reduction <minsi>, %21, %cst_11 [1] : vector<8x128xi32> to vector<8xi32>
    %23 = vector.shape_cast %22 : vector<8xi32> to vector<8x1xi32>
    %24 = vector.broadcast %23 : vector<8x1xi32> to vector<8x128xi32>
    %25 = arith.cmpi eq, %17, %24 : vector<8x128xi32>
    %26 = arith.extui %25 : vector<8x128xi1> to vector<8x128xi32>
    %27 = arith.sitofp %26 : vector<8x128xi32> to vector<8x128xf32>
    %c0_12 = arith.constant 0 : index
    %c0_13 = arith.constant 0 : index
    %c0_14 = arith.constant 0 : index
    %28 = vector.load %arg5[%c0_12, %c0_13, %c0_14] : memref<1x128x128xf32, #tpu.memory_space<vmem>>, vector<1x128x128xf32>
    %29 = vector.shape_cast %28 : vector<1x128x128xf32> to vector<128x128xf32>
    %cst_15 = arith.constant dense<0.000000e+00> : vector<8x128xf32>
    %30 = tpu.matmul %27, %29, %cst_15 {dimension_numbers = #tpu.dot_dimension_numbers<[1], [0], [0], [1], [0, 0, 1, 1], [], []>} : vector<8x128xf32>, vector<128x128xf32>, vector<8x128xf32> -> vector<8x128xf32>
    %c0_16 = arith.constant 0 : index
    %c0_17 = arith.constant 0 : index
    %31 = vector.load %arg7[%c0_16, %c0_17] : memref<8x1xf32, #tpu.memory_space<vmem>>, vector<8x1xf32>
    %32 = arith.cmpf olt, %16, %31 : vector<8x1xf32>
    %c0_18 = arith.constant 0 : index
    %c0_19 = arith.constant 0 : index
    %33 = vector.load %arg8[%c0_18, %c0_19] : memref<8x128xf32, #tpu.memory_space<vmem>>, vector<8x128xf32>
    %34 = vector.shape_cast %32 : vector<8x1xi1> to vector<8x1xi1>
    %35 = vector.broadcast %34 : vector<8x1xi1> to vector<8x128xi1>
    %36 = arith.select %35, %30, %33 : vector<8x128xi1>, vector<8x128xf32>
    %c0_20 = arith.constant 0 : index
    %c0_21 = arith.constant 0 : index
    %37 = vector.load %arg8[%c0_20, %c0_21] : memref<8x128xf32, #tpu.memory_space<vmem>>, vector<8x128xf32>
    tpu.vector_store %arg8[%c0_20, %c0_21], %36 {strides = array<i32>} : memref<8x128xf32, #tpu.memory_space<vmem>>, vector<8x128xf32>,
    %c0_22 = arith.constant 0 : index
    %c0_23 = arith.constant 0 : index
    %38 = vector.load %arg7[%c0_22, %c0_23] : memref<8x1xf32, #tpu.memory_space<vmem>>, vector<8x1xf32>
    %39 = arith.select %32, %16, %38 : vector<8x1xi1>, vector<8x1xf32>
    %c0_24 = arith.constant 0 : index
    %c0_25 = arith.constant 0 : index
    %40 = vector.load %arg7[%c0_24, %c0_25] : memref<8x1xf32, #tpu.memory_space<vmem>>, vector<8x1xf32>
    tpu.vector_store %arg7[%c0_24, %c0_25], %39 {strides = array<i32>} : memref<8x1xf32, #tpu.memory_space<vmem>>, vector<8x1xf32>,
    %c1_i32 = arith.constant 1 : i32
    %41 = arith.cmpi eq, %arg1, %c1_i32 : i32
    %42 = arith.extui %41 : i1 to i32
    %c0_i32_26 = arith.constant 0 : i32
    %43 = arith.cmpi ne, %42, %c0_i32_26 : i32
    scf.if %43 {
      %c0_27 = arith.constant 0 : index
      %c0_28 = arith.constant 0 : index
      %44 = vector.load %arg8[%c0_27, %c0_28] : memref<8x128xf32, #tpu.memory_space<vmem>>, vector<8x128xf32>
      %c0_29 = arith.constant 0 : index
      %c0_30 = arith.constant 0 : index
      %45 = vector.load %arg6[%c0_29, %c0_30] : memref<8x128xf32, #tpu.memory_space<vmem>>, vector<8x128xf32>
      tpu.vector_store %arg6[%c0_29, %c0_30], %44 {strides = array<i32>} : memref<8x128xf32, #tpu.memory_space<vmem>>, vector<8x128xf32>,
    } else {
    }
    return
  }
  func.func @transform_0(%arg0: i32, %arg1: i32) -> (i32, i32) {
    %c0_i32 = arith.constant 0 : i32
    %c0_i32_0 = arith.constant 0 : i32
    return %c0_i32, %arg0 : i32, i32
  }
  func.func @transform_1(%arg0: i32, %arg1: i32) -> (i32, i32, i32) {
    %c0_i32 = arith.constant 0 : i32
    %c0_i32_0 = arith.constant 0 : i32
    return %arg0, %arg1, %c0_i32 : i32, i32, i32
  }
  func.func @transform_2(%arg0: i32, %arg1: i32) -> (i32, i32, i32) {
    %c0_i32 = arith.constant 0 : i32
    %c0_i32_0 = arith.constant 0 : i32
    return %arg0, %c0_i32, %arg1 : i32, i32, i32
  }
  func.func @transform_3(%arg0: i32, %arg1: i32) -> (i32, i32, i32) {
    %c0_i32 = arith.constant 0 : i32
    %c0_i32_0 = arith.constant 0 : i32
    return %arg0, %arg1, %c0_i32 : i32, i32, i32
  }
  func.func @transform_4(%arg0: i32, %arg1: i32) -> (i32, i32) {
    %c0_i32 = arith.constant 0 : i32
    %c0_i32_0 = arith.constant 0 : i32
    return %c0_i32, %arg0 : i32, i32
  }
}

</mosaic_0001>

<bundles_post_ra>
// kernel: tpu_custom_call.1
= control target key start
LH: loop header
LB: loop body
LE: loop exit
PB: predicated region body
PF: predicated region fallthrough
CT: control target
= control target key end

     0   :  { %s1707_s0 = inlined_call_operand.hbm [shape: f32[8,512], index: 0, kind: input, shape index: {}]   ;;  %s1708_s1 = inlined_call_operand.hbm [shape: f32[4,256,128], index: 1, kind: input, shape index: {}]   ;;  %s1709_s2 = inlined_call_operand.hbm [shape: f32[4,1,256], index: 2, kind: input, shape index: {}]   ;;  %s1710_s3 = inlined_call_operand.hbm [shape: f32[4,256,128], index: 3, kind: input, shape index: {}]   ;;  %s1711_s4 = inlined_call_operand.hbm [shape: f32[8,512], index: 4, kind: output, shape index: {}]  }
   0x1   :  { %1728 = sst [smem:[#allocation28_spill]] %s1708_s1 }
   0x2   :  { %1729 = sst [smem:[#allocation29_spill]] %s1711_s4 }
   0x3   :  { %9 = vsyncpa [#allocation5], 0 }
   0x4   :  { %11 = vsyncpa [#allocation5 + $0x1], 0 }
   0x5   :  { %12 = vsyncpa [#allocation8], 0 }
   0x6   :  { %14 = vsyncpa [#allocation8 + $0x1], 0 }
   0x7   :  { %15 = vsyncpa [#allocation11], 0 }
   0x8   :  { %17 = vsyncpa [#allocation11 + $0x1], 0 }
   0x9   :  { %18 = vsyncpa [#allocation6], 0 }
   0xa   :  { %20 = vsyncpa [#allocation6 + $0x1], 0  ;;  %s1290_s15 = smov 0   ;;  %s1292_s16 = smov 0  }
   0xb   :  { %s1294_s17 = smov 0   ;;  %s1296_s18 = smov 0  }
   0xc   :  { %s1298_s19 = smov 0   ;;  %s1300_s20 = smov 0  }
   0xd   :  { %s1302_s21 = smov 0   ;;  %s1304_s22 = smov 0  }
   0xe   :  { %s1306_s23 = smov 0   ;;  %s1308_s24 = smov 0  }
   0xf   :  { %s1310_s25 = smov 0  }
  0x10 LB: > { %1730 = sst [smem:[#allocation17_spill]] %s1214_s16  ;;  %s35_s26 = sadd.s32 1, %s1242_s23  ;;  %s1250_s25 = sphi %s1310_s25, %s26_s25   ;;  %s1246_s24 = sphi %s1308_s24, %s1783_s24   ;;  %s1242_s23 = sphi %s1306_s23, %s1782_s23   ;;  %s1238_s22 = sphi %s1304_s22, %s1781_s22   ;;  %s1234_s21 = sphi %s1302_s21, %s1780_s21   ;;  %s1230_s20 = sphi %s1300_s20, %s1773_s20   ;;  %s1226_s19 = sphi %s1298_s19, %s1779_s19   ;;  %s1222_s18 = sphi %s1296_s18, %s1778_s18   ;;  %s1218_s17 = sphi %s1294_s17, %s1777_s17   ;;  %s1214_s16 = sphi %s1292_s16, %s1776_s16   ;;  %s1210_s15 = sphi %s1290_s15, %s1770_s15  }
  0x11   : > { %1731 = sst [smem:[#allocation18_spill]] %s1230_s20  ;;  %p53_p0 = scmp.eq.s32.totalorder %s1250_s25, 0 }
  0x12   : > { %1732 = sst [smem:[#allocation19_spill]] %s1234_s21  ;;  %p1347_p1 = scmp.ge.s32.totalorder %s35_s26, 2 }
  0x13   : > { %1733 = sst [smem:[#allocation20_spill]] %s1238_s22  ;;  %p80_p2 = scmp.ne.s32.totalorder %s1218_s17, %s1214_s16 }
  0x14   : > { %s1785_s26 = smov (%p1347_p1, %s35_s26), 0  ;;  %p910_p4 = scmp.lt.s32.totalorder %s1250_s25, 8 }
  0x15   : > { %1735 = sst [smem:[#allocation21_spill]] %s1785_s26  ;;  %p1360_p3 = por %p80_p2, %p53_p0 }
  0x16   : > { %s210_s5 = sand.u32 1, %s1250_s25   ;;  %s1369_s6 = sand.u32 1, %s1218_s17  }
  0x17   : > { %s1713_s7 = sshll.u32 %s1369_s6, 7  ;;  %s756_s8 = sshll.u32 %s1242_s23, 4 }
  0x18   : > { %s757_s9 = sshll.u32 %s1246_s24, 5  ;;  %s214_s11 = scalar_lea.vmem [#allocation7], %s1713_s7 }
  0x19   : > { %s1374_s10 = sadd.s32 %s757_s9, %s756_s8  ;;  %s223_s12 = sshll.u32 %s214_s11, 4  ;;  %s224_s12 = int_to_ptr.vmem [resolvable:$true] %s223_s12 }
  0x1a   : > { %s1717_s13 = sshll.u32 %s1374_s10, 7  ;;  %s1737_s1 = sld [smem:[#allocation28_spill]] }
  0x1b   : > { %p1388_p5 = pnand %p910_p4, %p1360_p3  ;;  %p765_p6 = scmp.ge.s32.totalorder %s1250_s25, 1 }
  0x1c   : > { %s1393_s8 = scalar_lea.sflag [#allocation8], %s210_s5  ;;  %s1023_s9 = scalar_lea.vmem %s224_s12, 2048 }
  0x1d   : > { %p1716_p7 = pneg %p1388_p5  ;;  %p1024_p8 = scmp.ne.s32.totalorder %s224_s12, %s1023_s9 }
  0x1e   : > { %s1252_s28 = smov [#allocation7]  }
  0x1f   : > { %p1026_p9 = pnand %p1024_p8, %p1716_p7  ;;  %s1028_s29 = sshll.u32 %s1252_s28, 4  ;;  %s1029_s29 = int_to_ptr.vmem [resolvable:$false] %s1028_s29 }
  0x20   : > { %s222_s30 = scalar_lea.hbm %s1737_s1, %s1717_s13  ;;  %s1030_s11 = scalar_lea.vmem %s1029_s29, 4096 }
  0x21   : > { %p1027_p10 = pneg %p1026_p9  ;;  %p1031_p11 = scmp.lt.s32.totalorder %s224_s12, %s1029_s29 }
  0x22   : > { %p1032_p12 = scmp.lt.s32.totalorder %s1030_s11, %s1023_s9 }
  0x24   : > { %p1033_p13 = por %p1032_p12, %p1031_p11 }
  0x26   : > { %p1034_p2 = pnand %p1033_p13, %p1027_p10 }
  0x28   : > { %1037 = shalt.err (!%p1034_p2)
}
  0x29   : > { %s1714_s14 = smov 128   ;;  %s1715_s5 = smov 8  }
  0x2a   : > { %899 = dma.hbm_to_vmem [thread:$0]  (!%p1388_p5), %s222_s30, 2048, %s224_s12, %s1393_s8, %s1714_s14, %s1714_s14, %s1715_s5  }
  0x2b   : > { %p273_p3 = scmp.lt.s32.totalorder %s1250_s25, 9  ;;  %s1414_s28 = sadd.s32 4294967295, %s1250_s25  }
  0x2c   : > { %1740 = sst [smem:[#allocation22_spill]] %s1414_s28  ;;  %s750_s29 = sadd.s32 4294967294, %s1250_s25  }
  0x2d   : > { %p1409_p8 = pnand %p765_p6, %p273_p3  ;;  %s38_s11 = sadd.s32 1, %s1246_s24 }
  0x2e   : > { %s45_s7 = sadd.s32 1, %s1230_s20  ;;  %s1787_s11 = smov (!%p1347_p1, %s38_s11), %s1246_s24 }
  0x2f   : > { %p52_p9 = scmp.ne.s32.totalorder %s1230_s20, %s1226_s19  ;;  %p58_p6 = scmp.ne.s32.totalorder %s1226_s19, %s1222_s18 }
  0x30   : > { %p40_p10 = scmp.ge.s32.totalorder %s1787_s11, 4  ;;  %p59_p11 = scmp.eq.s32.totalorder %s1414_s28, 0 }
  0x31   : > { %p1432_p12 = por %p53_p0, %p52_p9  ;;  %p86_p13 = scmp.ne.s32.totalorder %s1214_s16, %s1210_s15 }
  0x32   : > { %s1789_s11 = smov (%p40_p10, %s1787_s11), 0  ;;  %p1443_p1 = por %p59_p11, %p58_p6 }
  0x33   : > { %1742 = sst [smem:[#allocation23_spill]] %s1789_s11  ;;  %p1447_p2 = por %p86_p13, %p59_p11 }
  0x34   : > { %s42_s14 = ssub.s32 %s1246_s24, %s1789_s11  ;;  %p166_p0 = scmp.eq.s32.totalorder %s1414_s28, 7 }
  0x35   : > { %s1744_s12 = scalar_select %p1447_p2, 1, 0 }
  0x36   : > { %p43_p3 = scmp.eq.s32.totalorder %s42_s14, 0  ;;  %s1746_s5 = ssub.s32 %s1242_s23, %s1785_s26 }
  0x37   : > { %1745 = sst [smem:[#allocation24_spill]] %s1744_s12  ;;  %s70_s15 = sor.u32 %s1746_s5, %s42_s14 }
  0x38   : > { %p71_p10 = scmp.eq.s32.totalorder %s70_s15, 0  ;;  %p1460_p7 = por %p166_p0, %p52_p9 }
  0x39   : > { %s1465_s1 = scalar_select %p43_p3, %s1230_s20, %s45_s7  }
  0x3a   : > { %s1747_s13 = scalar_select %p1460_p7, 1, 0 }
  0x3b   : > { %1749 = sst [smem:[#allocation26_spill]] %s1465_s1  ;;  %s1750_s22 = sadd.s32 1, %s1218_s17 }
  0x3c   : > { %1748 = sst [smem:[#allocation25_spill]] %s1747_s13  ;;  %p172_p11 = scmp.eq.s32.totalorder %s750_s29, 7 }
  0x3d   : > { %s1470_s21 = scalar_select %p71_p10, %s1218_s17, %s1750_s22  }
  0x3e   : > { %s192_s11 = sand.u32 1, %s1230_s20   ;;  %p1476_p13 = por %p172_p11, %p58_p6 }
  0x3f   : > { %1751 = sst [smem:[#allocation27_spill]] %s1470_s21  ;;  %s753_s12 = sshll.u32 %s192_s11, 3 }
  0x40   : > { %s1752_s26 = scalar_select %p1476_p13, 1, 0 }
  0x41   : > { %s754_s14 = sshll.u32 %s1246_s24, 7  ;;  %s196_s5 = scalar_lea.vmem [#allocation4], %s753_s12 }
  0x42   : > { %s203_s15 = sshll.u32 %s196_s5, 4  ;;  %s201_s13 = scalar_lea.hbm %s1707_s0, %s754_s14  ;;  %s204_s15 = int_to_ptr.vmem [resolvable:$true] %s203_s15 }
  0x43   : > { %p1488_p9 = pnand %p910_p4, %p1432_p12  ;;  %s759_s7 = sshll.u32 %s1246_s24, 1 }
  0x44   : > { %s236_s29 = scalar_lea.vmem [#allocation9], %s1369_s6  ;;  %s241_s20 = sadd.s32 %s1242_s23, %s759_s7 }
  0x45   : > { %s245_s1 = sshll.u32 %s236_s29, 4  ;;  %s193_s21 = scalar_lea.sflag [#allocation5], %s192_s11  ;;  %s246_s1 = int_to_ptr.vmem [resolvable:$true] %s245_s1 }
  0x46   : > { %p1040_p6 = pneg %p1488_p9  ;;  %s1051_s12 = scalar_lea.vmem %s204_s15, 128 }
  0x47   : > { %p1052_p0 = scmp.ne.s32.totalorder %s204_s15, %s1051_s12  ;;  %s1255_s16 = smov [#allocation4]  }
  0x48   : > { %s1056_s28 = sshll.u32 %s1255_s16, 4  ;;  %s1057_s28 = int_to_ptr.vmem [resolvable:$false] %s1056_s28 }
  0x49   : > { %p1054_p3 = pnand %p1052_p0, %p1040_p6  ;;  %s1058_s30 = scalar_lea.vmem %s1057_s28, 256 }
  0x4a   : > { %p1059_p4 = scmp.lt.s32.totalorder %s204_s15, %s1057_s28  ;;  %p1060_p12 = scmp.lt.s32.totalorder %s1058_s30, %s1051_s12 }
  0x4b   : > { %p1055_p10 = pneg %p1054_p3 }
  0x4c   : > { %p1061_p11 = por %p1060_p12, %p1059_p4 }
  0x4e   : > { %p1062_p13 = pnand %p1061_p11, %p1055_p10 }
  0x50   : > { %1065 = shalt.err (!%p1062_p13)
}
  0x51   : > { %896 = dma.hbm_to_vmem [thread:$0]  (!%p1488_p9), %s201_s13, 128, %s204_s15, %s193_s21  }
  0x52   : > { %s760_s11 = sshll.u32 %s241_s20, 4  ;;  %s1079_s29 = scalar_lea.vmem %s246_s1, 16 }
  0x53   : > { %s243_s7 = scalar_lea.hbm %s1709_s2, %s760_s11  ;;  %p1080_p6 = scmp.ne.s32.totalorder %s246_s1, %s1079_s29 }
  0x54   : > { %p1754_p0 = pneg %p1388_p5  ;;  %s1256_s12 = smov [#allocation9]  }
  0x55   : > { %s1084_s16 = sshll.u32 %s1256_s12, 4  ;;  %s1085_s16 = int_to_ptr.vmem [resolvable:$false] %s1084_s16 }
  0x56   : > { %p1082_p3 = pnand %p1080_p6, %p1754_p0  ;;  %s1086_s28 = scalar_lea.vmem %s1085_s16, 32 }
  0x57   : > { %p1087_p13 = scmp.lt.s32.totalorder %s246_s1, %s1085_s16  ;;  %p1088_p10 = scmp.lt.s32.totalorder %s1086_s28, %s1079_s29 }
  0x58   : > { %p1083_p7 = pneg %p1082_p3 }
  0x59   : > { %p1089_p4 = por %p1088_p10, %p1087_p13 }
  0x5b   : > { %p1090_p9 = pnand %p1089_p4, %p1083_p7 }
  0x5d   : > { %1093 = shalt.err (!%p1090_p9)
}
  0x5e   : > { %902 = dma.hbm_to_vmem [thread:$0]  (!%p1388_p5), %s243_s7, 16, %s246_s1, %s1393_s8  }
  0x5f   : > { %s1755_s20 = sshll.u32 %s1374_s10, 7  ;;  %s1756_s22 = sshll.u32 %s1369_s6, 7 }
  0x60   : > { %s264_s15 = scalar_lea.hbm %s1710_s3, %s1755_s20  ;;  %s256_s30 = scalar_lea.vmem [#allocation10], %s1756_s22 }
  0x61   : > { %s265_s11 = sshll.u32 %s256_s30, 4  ;;  %s253_s14 = scalar_lea.sflag [#allocation11], %s1369_s6  ;;  %s266_s11 = int_to_ptr.vmem [resolvable:$true] %s265_s11 }
  0x62   : > { %s1107_s5 = scalar_lea.vmem %s266_s11, 2048  ;;  %p1757_p12 = pmov %p1754_p0 }
  0x63   : > { %p1108_p7 = scmp.ne.s32.totalorder %s266_s11, %s1107_s5  ;;  %s1257_s29 = smov [#allocation10]  }
  0x64   : > { %s1112_s12 = sshll.u32 %s1257_s29, 4  ;;  %s1113_s12 = int_to_ptr.vmem [resolvable:$false] %s1112_s12 }
  0x65   : > { %p1110_p11 = pnand %p1108_p7, %p1757_p12  ;;  %s1114_s1 = scalar_lea.vmem %s1113_s12, 4096 }
  0x66   : > { %p1115_p0 = scmp.lt.s32.totalorder %s266_s11, %s1113_s12  ;;  %p1116_p3 = scmp.lt.s32.totalorder %s1114_s1, %s1107_s5 }
  0x67   : > { %p1111_p6 = pneg %p1110_p11 }
  0x68   : > { %p1117_p13 = por %p1116_p3, %p1115_p0 }
  0x6a   : > { %p1118_p10 = pnand %p1117_p13, %p1111_p6 }
  0x6c   : > { %1121 = shalt.err (!%p1118_p10)
}
  0x6d   : > { %s1758_s10 = smov 8   ;;  %s1759_s8 = smov 128  }
  0x6e   : > { %905 = dma.hbm_to_vmem [thread:$0]  (!%p1388_p5), %s264_s15, 2048, %s266_s11, %s253_s14, %s1759_s8, %s1759_s8, %s1758_s10  }
  0x6f   : > { %277 = sbr.rel (%p1409_p8) target bundleno = 1065 (0x429), region = 36  ;;  %s1527_s6 = sand.u32 (!%p1409_p8), 1, %s1226_s19  }
  0x70   : > { %s766_s7 = sshll.u32 (!%p1409_p8), %s1527_s6, 3  ;;  %s280_s16 = scalar_lea.sflag (!%p1409_p8), [#allocation5], %s1527_s6 }
  0x71   : > { %s1531_s28 = scalar_lea.vmem (!%p1409_p8), [#allocation4], %s766_s7 }
  0x74   : > { %1193 = dma.done.wait (%p1443_p1), %s280_s16, 128  }
  0x75   : > { %1195 = vsyncadd (%p1443_p1), %s280_s16, 4294967168  ;;  %s1760_s4 = sld [smem:[#allocation22_spill]] }
  0x76   : > { %s1761_s20 = sld [smem:[#allocation17_spill]] }
  0x7b   : > { %s288_s9 = sand.u32 1, %s1760_s4  }
  0x7c   : > { %s1539_s13 = sand.u32 1, %s1761_s20   ;;  %s289_s22 = scalar_lea.sflag [#allocation8], %s288_s9 }
  0x7d   : > { %s767_s15 = sshll.u32 %s1539_s13, 7 }
  0x7e   : > { %s1542_s30 = scalar_lea.vmem [#allocation7], %s767_s15 }
  0x7f   : > { %1197 = dma.done.wait (%p1447_p2), %s289_s22, 2064  }
  0x80   : > { %1199 = vsyncadd (%p1447_p2), %s289_s22, 4294965232  ;;  %s300_s27 = scalar_lea.vmem [#allocation9], %s1539_s13  ;;  %s306_s11 = scalar_lea.sflag [#allocation11], %s1539_s13 }
  0x81   : > { %s1550_s14 = scalar_lea.vmem [#allocation10], %s767_s15 }
  0x82   : > { %1201 = dma.done.wait (%p1447_p2), %s306_s11, 2048  }
  0x83   : > { %1203 = vsyncadd (%p1447_p2), %s306_s11, 4294965248  ;;  %s1556_s5 = scalar_lea.vmem [#allocation12], %s766_s7  ;;  %s1763_s29 = sld [smem:[#allocation19_spill]] }
  0x89   : > { %p770_p5 = scmp.ne.s32.totalorder %s1763_s29, 0 }
  0x8b   : > { %353 = sbr.rel (%p770_p5) target bundleno = 146 (0x92), region = 56 }
  0x90   : > { %vm354_vm0 = vcmask 7168   ;;  %v1258_v0 = vmov inf   ;;  %v1259_v1 = vmov 0.0  }
  0x91   : > { %355 = vst.msk [vmem:[#allocation2] sm:$0xff] %vm354_vm0, %v1258_v0  ;;  %356 = vst [vmem:[#allocation3] sm:$0xff] %v1259_v1 }
  0x92 PF: > { %v374_v2 = vld [vmem:[%s1542_s30 + $0x78] sm:$0xff]  ;;  %v1260_v3 = vmov 0.0   ;;  %vm1261_vm1 = vmmov 0   ;;  %v373_v4 = vld [vmem:[%s1542_s30 + $0x70] sm:$0xff]  ;;  %v372_v5 = vld [vmem:[%s1542_s30 + $0x68] sm:$0xff]  ;;  %v1262_v26 = vmov 0   ;;  %v456_v27 = vlaneseq }
  0x93   : > { %813 = vmatprep.subr.mxu0 %v1260_v3  ;;  %845 = vmatprep.mubr.msk.f32.mxu0 %vm1261_vm1, %v1260_v3  ;;  %v371_v6 = vld [vmem:[%s1542_s30 + $0x60] sm:$0xff]  ;;  %v370_v7 = vld [vmem:[%s1542_s30 + $0x58] sm:$0xff]  ;;  %v369_v8 = vld [vmem:[%s1542_s30 + $0x50] sm:$0xff]  ;;  %vm575_vm2 = vcmask 7168   ;;  %v1263_v61 = vmov 1.0   ;;  %s1764_s12 = sld [smem:[#allocation19_spill]] }
  0x94   : > { %814 = vmatpush3.xpose.msra.mxu0 %v374_v2  ;;  %848 = vmatprep.subr.mxu1 %v1260_v3  ;;  %v368_v9 = vld [vmem:[%s1542_s30 + $0x48] sm:$0xff]  ;;  %v367_v10 = vld [vmem:[%s1542_s30 + $0x40] sm:$0xff]  ;;  %v366_v11 = vld [vmem:[%s1542_s30 + $0x38] sm:$0xff]  ;;  %v1599_v28 = vand.u32 127, %v456_v27 }
  0x95   : > { %815 = vmatprep.subr.mxu0 %v1260_v3  ;;  %880 = vmatprep.mubr.msk.f32.mxu1 %vm1261_vm1, %v1260_v3  ;;  %v365_v12 = vld [vmem:[%s1542_s30 + $0x30] sm:$0xff]  ;;  %v364_v13 = vld [vmem:[%s1542_s30 + $0x28] sm:$0xff]  ;;  %v363_v14 = vld [vmem:[%s1542_s30 + $0x20] sm:$0xff] }
  0x96   : > { %v362_v15 = vld [vmem:[%s1542_s30 + $0x18] sm:$0xff]  ;;  %v361_v16 = vld [vmem:[%s1542_s30 + $0x10] sm:$0xff]  ;;  %v360_v17 = vld [vmem:[%s1542_s30 + $0x8] sm:$0xff]  ;;  %1008 = vset.pattern.permute.xlu1 %v1262_v26  ;;  %1009 = vset.pattern.permute.xlu0 %v1262_v26 }
  0x97   : > { %v357_v18 = vld [vmem:[%s1531_s28] sm:$0xff]  ;;  %v359_v19 = vld [vmem:[%s1542_s30] sm:$0xff] }
  0x98   : > { %816 = vmatpush3.xpose.msra.mxu0 %v373_v4  ;;  %v358_v20 = vmax.f32 %v357_v18, 0.0  ;;  %v771_v22 = vld [vmem:[%s300_s27] ss:$0 sm:$0xff]  ;;  %v491_v36 = vld [vmem:[%s1550_s14 + $0x70] sm:$0xff]  ;;  %v490_v37 = vld [vmem:[%s1550_s14 + $0x68] sm:$0xff] }
  0x99   : > { %817 = vmatprep.subr.mxu0 %v1260_v3  ;;  %v1601_v29 = vld [vmem:[#allocation2] sm:$0xff]  ;;  %v487_v40 = vld [vmem:[%s1550_s14 + $0x50] sm:$0xff]  ;;  %v486_v41 = vld [vmem:[%s1550_s14 + $0x48] sm:$0xff]  ;;  %p774_p8 = scmp.ne.s32.totalorder %s1764_s12, 1 }
  0x9a   : > { %v492_v35 = vld [vmem:[%s1550_s14 + $0x78] sm:$0xff]  ;;  %v489_v38 = vld [vmem:[%s1550_s14 + $0x60] sm:$0xff]  ;;  %v483_v44 = vld [vmem:[%s1550_s14 + $0x30] sm:$0xff] }
  0x9b   : > { %849 = vmatpush3.msra.mxu1 %v492_v35  ;;  %v488_v39 = vld [vmem:[%s1550_s14 + $0x58] sm:$0xff]  ;;  %v485_v42 = vld [vmem:[%s1550_s14 + $0x40] sm:$0xff]  ;;  %v482_v45 = vld [vmem:[%s1550_s14 + $0x28] sm:$0xff] }
  0x9c   : > { %818 = vmatpush3.xpose.msra.mxu0 %v372_v5  ;;  %850 = vmatprep.subr.mxu1 %v1260_v3  ;;  %v484_v43 = vld [vmem:[%s1550_s14 + $0x38] sm:$0xff]  ;;  %v481_v46 = vld [vmem:[%s1550_s14 + $0x20] sm:$0xff]  ;;  %v479_v52 = vld [vmem:[%s1550_s14 + $0x10] sm:$0xff] }
  0x9d   : > { %819 = vmatprep.subr.mxu0 %v1260_v3  ;;  %851 = vmatpush3.msra.mxu1 %v491_v36  ;;  %v480_v47 = vld [vmem:[%s1550_s14 + $0x18] sm:$0xff]  ;;  %v478_v53 = vld [vmem:[%s1550_s14 + $0x8] sm:$0xff]  ;;  %v477_v54 = vld [vmem:[%s1550_s14] sm:$0xff] }
  0x9e   : > { %852 = vmatprep.subr.mxu1 %v1260_v3  ;;  %v565_v63 = vld [vmem:[#allocation3] sm:$0xff] }
  0x9f   : > { %853 = vmatpush3.msra.mxu1 %v490_v37 }
  0xa0   : > { %820 = vmatpush3.xpose.msra.mxu0 %v371_v6  ;;  %854 = vmatprep.subr.mxu1 %v1260_v3 }
  0xa1   : > { %821 = vmatprep.subr.mxu0 %v1260_v3  ;;  %855 = vmatpush3.msra.mxu1 %v489_v38 }
  0xa2   : > { %856 = vmatprep.subr.mxu1 %v1260_v3 }
  0xa3   : > { %857 = vmatpush3.msra.mxu1 %v488_v39 }
  0xa4   : > { %822 = vmatpush3.xpose.msra.mxu0 %v370_v7  ;;  %858 = vmatprep.subr.mxu1 %v1260_v3 }
  0xa5   : > { %823 = vmatprep.subr.mxu0 %v1260_v3  ;;  %859 = vmatpush3.msra.mxu1 %v487_v40 }
  0xa6   : > { %860 = vmatprep.subr.mxu1 %v1260_v3 }
  0xa7   : > { %861 = vmatpush3.msra.mxu1 %v486_v41 }
  0xa8   : > { %824 = vmatpush3.xpose.msra.mxu0 %v369_v8  ;;  %862 = vmatprep.subr.mxu1 %v1260_v3 }
  0xa9   : > { %825 = vmatprep.subr.mxu0 %v1260_v3  ;;  %863 = vmatpush3.msra.mxu1 %v485_v42 }
  0xaa   : > { %864 = vmatprep.subr.mxu1 %v1260_v3 }
  0xab   : > { %865 = vmatpush3.msra.mxu1 %v484_v43 }
  0xac   : > { %826 = vmatpush3.xpose.msra.mxu0 %v368_v9  ;;  %866 = vmatprep.subr.mxu1 %v1260_v3 }
  0xad   : > { %827 = vmatprep.subr.mxu0 %v1260_v3  ;;  %867 = vmatpush3.msra.mxu1 %v483_v44 }
  0xae   : > { %868 = vmatprep.subr.mxu1 %v1260_v3 }
  0xaf   : > { %869 = vmatpush3.msra.mxu1 %v482_v45 }
  0xb0   : > { %828 = vmatpush3.xpose.msra.mxu0 %v367_v10  ;;  %870 = vmatprep.subr.mxu1 %v1260_v3 }
  0xb1   : > { %829 = vmatprep.subr.mxu0 %v1260_v3  ;;  %871 = vmatpush3.msra.mxu1 %v481_v46 }
  0xb2   : > { %872 = vmatprep.subr.mxu1 %v1260_v3 }
  0xb3   : > { %873 = vmatpush3.msra.mxu1 %v480_v47 }
  0xb4   : > { %830 = vmatpush3.xpose.msra.mxu0 %v366_v11  ;;  %874 = vmatprep.subr.mxu1 %v1260_v3 }
  0xb5   : > { %831 = vmatprep.subr.mxu0 %v1260_v3  ;;  %875 = vmatpush3.msra.mxu1 %v479_v52 }
  0xb6   : > { %876 = vmatprep.subr.mxu1 %v1260_v3 }
  0xb7   : > { %877 = vmatpush3.msra.mxu1 %v478_v53 }
  0xb8   : > { %832 = vmatpush3.xpose.msra.mxu0 %v365_v12  ;;  %878 = vmatprep.subr.mxu1 %v1260_v3 }
  0xb9   : > { %833 = vmatprep.subr.mxu0 %v1260_v3  ;;  %879 = vmatpush3.msra.mxu1 %v477_v54 }
  0xbc   : > { %834 = vmatpush3.xpose.msra.mxu0 %v364_v13 }
  0xbd   : > { %835 = vmatprep.subr.mxu0 %v1260_v3 }
  0xc0   : > { %836 = vmatpush3.xpose.msra.mxu0 %v363_v14 }
  0xc1   : > { %837 = vmatprep.subr.mxu0 %v1260_v3 }
  0xc4   : > { %838 = vmatpush3.xpose.msra.mxu0 %v362_v15 }
  0xc5   : > { %839 = vmatprep.subr.mxu0 %v1260_v3 }
  0xc8   : > { %840 = vmatpush3.xpose.msra.mxu0 %v361_v16 }
  0xc9   : > { %841 = vmatprep.subr.mxu0 %v1260_v3 }
  0xcc   : > { %842 = vmatpush3.xpose.msra.mxu0 %v360_v17 }
  0xcd   : > { %843 = vmatprep.subr.mxu0 %v1260_v3 }
  0xd0   : > { %844 = vmatpush3.xpose.msra.mxu0 %v359_v19 }
  0xd3   : > { %846 = vmatmul.mubr.f32.vlgmr.msra.gmra.mxu0 %v358_v20 }
 0x193   : > { %v441_v21 = vpop.f32.mrf.mxu0 }
 0x194   : > { %v446_v23 = vmul.f32 2.0, %v441_v21 }
 0x195   : > { %v847_v24 = vpop.f32.mrf.mxu0 }
 0x196   : > { %v453_v25 = vsub.f32 %v771_v22, %v446_v23 }
 0x198   : > { %454 = vmin.xlane.f32.xlu0 %v453_v25 }
 0x221   : > { %v1603_v30 = vpop.xlane.xlu0 %454 }
 0x222   : > { %vm458_vm3 = vcmp.eq.f32.partialorder %v453_v25, %v1603_v30  ;;  %vm564_vm4 = vcmp.lt.f32.partialorder %v1603_v30, %v1601_v29 }
 0x223   : > { %v459_v31 = vsel %vm458_vm3, %v1599_v28, 128  ;;  %v574_v32 = vsel %vm564_vm4, %v1603_v30, %v1601_v29  ;;  %v566_v55 = vsel %vm564_vm4, 1, %v1262_v26 }
 0x224   : > { %v461_v33 = vshra.s32 %v459_v31, 16  ;;  %576 = vst.msk [vmem:[#allocation2] sm:$0xff] %vm575_vm2, %v574_v32  ;;  %v460_v48 = vand.u32 65535, %v459_v31 }
 0x226   : > { %v463_v34 = vcvt.s32.f32 %v461_v33  ;;  %v462_v50 = vcvt.s32.f32 %v460_v48 }
 0x228   : > { %464 = vmin.xlane.f32.xlu0 %v463_v34 }
 0x2b1   : > { %v465_v49 = vpop.xlane.xlu0 %464 }
 0x2b2   : > { %vm466_vm5 = vcmp.eq.f32.partialorder %v463_v34, %v465_v49  ;;  %v471_v56 = vcvt.f32.s32 %v465_v49 }
 0x2b3   : > { %v467_v51 = vsel %vm466_vm5, %v462_v50, inf }
 0x2b4   : > { %468 = vmin.xlane.f32.xlu1 %v467_v51  ;;  %v472_v58 = vshll.u32 %v471_v56, 16 }
 0x2c5   : > { %568 = vperm.xlu1 %1008, %v566_v55  }
 0x33d   : > { %v469_v57 = vpop.xlane.xlu1 %468 }
 0x33e   : > { %v470_v59 = vcvt.f32.s32 %v469_v57 }
 0x340   : > { %v473_v60 = vadd.s32 %v472_v58, %v470_v59 }
 0x341   : > { %v569_v62 = vpop.permute.xlu1 %568 }
 0x342   : > { %vm474_vm6 = vcmp.eq.s32.totalorder %v1599_v28, %v473_v60  ;;  %vm570_vm7 = vcmp.eq.s32.totalorder %v569_v62, 1 }
 0x343   : > { %881 = vmatmul.mubr.msk.f32.vlgmr.msra.gmra.mxu1 %vm474_vm6, %v1263_v61 }
 0x401   : > { %580 = sbr.rel (%p774_p8) target bundleno = 1038 (0x40e), region = 60 }
 0x403   : > { %v559_v0 = vpop.f32.mrf.mxu1 }
 0x404   : > { %v571_v1 = vsel %vm570_vm7, %v559_v0, %v565_v63 }
 0x405   : > { %572 = vst [vmem:[#allocation3] sm:$0xff] %v571_v1  ;;  %v882_v2 = vpop.f32.mrf.mxu1 }
 0x40c   : > { %v581_v3 = vld [vmem:[#allocation3] sm:$0xff] }
 0x40d   : > { %582 = vst [vmem:[%s1556_s5] sm:$0xff] %v581_v3 }
 0x40e PF: > { %s1765_s1 = sld [smem:[#allocation20_spill]]  ;;  %s597_s20 = sshll.u32 %s1556_s5, 4  ;;  %s598_s20 = int_to_ptr.vmem [resolvable:$true] %s597_s20 }
 0x40f   : > { %s1766_s10 = sld [smem:[#allocation25_spill]]  ;;  %s584_s21 = scalar_lea.sflag [#allocation6], %s1527_s6 }
 0x410   : > { %s1767_s28 = sld [smem:[#allocation29_spill]]  ;;  %s1122_s9 = scalar_lea.vmem %s598_s20, 128 }
 0x411   : > { %p1123_p1 = scmp.ne.s32.totalorder %s598_s20, %s1122_s9  ;;  %s1264_s13 = smov [#allocation12]  }
 0x412   : > { %s1126_s15 = sshll.u32 %s1264_s13, 4  ;;  %s1127_s15 = int_to_ptr.vmem [resolvable:$false] %s1126_s15 }
 0x413   : > { %s1128_s22 = scalar_lea.vmem %s1127_s15, 256  ;;  %p1129_p7 = scmp.lt.s32.totalorder %s598_s20, %s1127_s15 }
 0x414   : > { %s776_s8 = sshll.u32 %s1765_s1, 7  ;;  %p1130_p12 = scmp.lt.s32.totalorder %s1128_s22, %s1122_s9 }
 0x415   : > { %p1768_p2 = scmp.ne.s32.totalorder %s1766_s10, 0 }
 0x416   : > { %s595_s4 = scalar_lea.hbm %s1767_s28, %s776_s8  ;;  %p1131_p11 = por %p1130_p12, %p1129_p7 }
 0x417   : > { %p1124_p4 = pnand %p1123_p1, %p1768_p2 }
 0x419   : > { %p1125_p9 = pneg %p1124_p4 }
 0x41b   : > { %p1132_p6 = pnand %p1131_p11, %p1125_p9 }
 0x41d   : > { %1135 = shalt.err (!%p1132_p6)
}
 0x41e   : > { %s1136_s30 = scalar_lea.hbm %s595_s4, 128  ;;  %s1140_s11 = scalar_lea.hbm %s1767_s28, 512 }
 0x41f   : > { %p1137_p0 = scmp.ne.s32.totalorder %s595_s4, %s1136_s30  ;;  %p1141_p10 = scmp.lt.s32.totalorder %s595_s4, %s1767_s28 }
 0x420   : > { %p1142_p5 = scmp.lt.s32.totalorder %s1140_s11, %s1136_s30 }
 0x421   : > { %p1138_p3 = pnand %p1137_p0, %p1768_p2 }
 0x422   : > { %p1143_p8 = por %p1142_p5, %p1141_p10 }
 0x423   : > { %p1139_p13 = pneg %p1138_p3 }
 0x425   : > { %p1144_p1 = pnand %p1143_p8, %p1139_p13 }
 0x427   : > { %1147 = shalt.err (!%p1144_p1)
}
 0x428   : > { %891 = dma.vmem_to_hbm [thread:$0]  (%p1768_p2), %s598_s20, 128, %s595_s4, %s584_s21  }
 0x429 PF: > { %p911_p4 = scmp.ge.s32.totalorder %s1250_s25, 2  ;;  %s609_s29 = sand.u32 1, %s1222_s18  }
 0x42a   : > { %p1769_p9 = scmp.ne.s32.totalorder %s1752_s26, 0  ;;  %s610_s12 = scalar_lea.sflag [#allocation6], %s609_s29 }
 0x42c   : > { %p907_p7 = pnand %p911_p4, %p1769_p9 }
 0x42e   : > { %p908_p12 = pneg %p907_p7 }
 0x430   : > { %1205 = dma.done.wait (%p908_p12), %s610_s12, 128  }
 0x431   : > { %1207 = vsyncadd (%p908_p12), %s610_s12, 4294967168  ;;  %s26_s25 = sadd.s32 1, %s1250_s25   ;;  %s1770_s15 = sld [smem:[#allocation17_spill]] }
 0x432   : > { %p23_p11 = scmp.ge.s32.totalorder %s26_s25, 10   ;;  %s1771_s1 = sld [smem:[#allocation27_spill]] }
 0x433   : > { %s1772_s10 = sld [smem:[#allocation18_spill]]  ;;  %s1776_s16 = smov %s1218_s17 }
 0x434   : > { %s1773_s20 = sld [smem:[#allocation26_spill]]  ;;  %s1778_s18 = smov %s1226_s19 }
 0x435   : > { %s1774_s8 = sld [smem:[#allocation21_spill]]  ;;  %s1780_s21 = smov %s1242_s23 }
 0x436   : > { %s1775_s7 = sld [smem:[#allocation23_spill]]  ;;  %s1781_s22 = smov %s1246_s24 }
 0x438   : > { %s1777_s17 = smov %s1771_s1  ;;  %25 = sbr.rel (!%p23_p11) target bundleno = 16 (0x10), region = 126 }
 0x439   : > { %s1779_s19 = smov %s1772_s10 }
 0x43b   : > { %s1782_s23 = smov %s1774_s8 }
 0x43c   : > { %s1783_s24 = smov %s1775_s7 }
 0x43d   :  { %615 = vsyncpa [#allocation5], 1 }
 0x43e   :  { %617 = vsyncpa [#allocation5 + $0x1], 1 }
 0x43f   :  { %618 = vsyncpa [#allocation8], 1 }
 0x440   :  { %620 = vsyncpa [#allocation8 + $0x1], 1 }
 0x441   :  { %621 = vsyncpa [#allocation11], 1 }
 0x442   :  { %623 = vsyncpa [#allocation11 + $0x1], 1 }
 0x443   :  { %624 = vsyncpa [#allocation6], 1 }
 0x444   :  { %626 = vsyncpa [#allocation6 + $0x1], 1 }

</bundles_post_ra>
